<compile_context>
chip_gen: v5e
topology: v5e:2x2
jax: 0.10.0
libtpu: 0.0.40
codegen_flags: <defaults>
</compile_context>

<pallas_src>
import math

import numpy as np
import jax
import jax.numpy as jnp
from jax.experimental import pallas as pl
from jax.experimental.pallas import tpu as pltpu


# ----------------------------------------------------------------------------
# Host-side construction of the positional-encoding table (PyTorch __init__).
# ----------------------------------------------------------------------------
def make_positional_encoding(d_model: int, max_len: int = 16) -> jnp.ndarray:
    """Deterministic replication of PositionalEncoding.__init__ -> [max_len, d_model]."""
    pe = np.zeros((max_len, d_model), dtype=np.float32)
    for pos in range(max_len):
        row = pos // 4
        col = pos % 4
        for i in range(0, d_model, 4):
            pe[pos, i] = math.sin(row / 10000 ** (i / d_model))
            if i + 1 < d_model:  # guard (original would OOB if d_model % 4 == 1)
                pe[pos, i + 1] = math.cos(row / 10000 ** (i / d_model))
            if i + 2 < d_model:
                pe[pos, i + 2] = math.sin(col / 10000 ** ((i + 2) / d_model))
            if i + 3 < d_model:
                pe[pos, i + 3] = math.cos(col / 10000 ** ((i + 3) / d_model))
    return jnp.asarray(pe)


# ----------------------------------------------------------------------------
# Kernel: pure broadcast-add of a (1, lane_chunk) pe tile onto a (bt, lane_chunk)
# batch tile.  Both operands are the same dtype (wrapper casts pe), so bf16
# stays bf16; the final cast is a no-op safety net.
# ----------------------------------------------------------------------------
def _add_pe_kernel(x_ref, pe_ref, o_ref):
    o_ref[...] = (x_ref[...] + pe_ref[...]).astype(o_ref.dtype)


# ----------------------------------------------------------------------------
# Tiling helpers.
# ----------------------------------------------------------------------------
def _round_up(v: int, m: int) -> int:
    return ((v + m - 1) // m) * m


def _choose_tiles(B: int, SD: int, itemsize: int, tile_budget_bytes: int):
    """Pick (bt, lane_chunk) obeying the (8,128) rule with tile <= ~budget bytes."""
    row_bytes = SD * itemsize

    # Lane axis: budget one row at tile_budget / sublane_floor so that after
    # the 8-row sublane floor the full tile still fits the budget.
    sub_floor = 8 if B >= 8 else max(B, 1)
    lane_budget_bytes = max(tile_budget_bytes // sub_floor, 128 * itemsize)

    if row_bytes <= lane_budget_bytes or SD <= 128:
        lane_chunk = SD                                   # full row (full dim is legal)
    else:
        budget_lanes = max(128, (lane_budget_bytes // itemsize) // 128 * 128)
        lane_chunk = min(SD, budget_lanes)
        # Prefer a multiple-of-128 chunk that divides SD evenly, so every store
        # is a full-lane unmasked vst (single store slot on v5e).
        cand = lane_chunk
        while cand >= 128 and SD % cand != 0:
            cand -= 128
        if cand >= 128:
            lane_chunk = cand
        # else: keep lane_chunk (multiple of 128); ragged last block is handled
        # by Pallas with masked stores on the final step only.

    chunk_bytes = lane_chunk * itemsize

    # Batch axis.
    if B <= 8:
        bt = B                                            # full dim satisfies sublane rule
    else:
        rows_budget = max(8, (tile_budget_bytes // max(chunk_bytes, 1)) // 8 * 8)
        bt = min(B, rows_budget)
        if bt < B:
            bt = max(8, (bt // 8) * 8)                    # multiple of 8 when tiling batch
    return bt, lane_chunk


def _ensure_two_steps(B: int, SD: int, bt: int, lane_chunk: int):
    """Guarantee >= 2 grid steps so the parallel axis shards across v7x's 2 TCs
    and read/write DMAs can overlap."""
    nb = -(-B // bt)
    nl = -(-SD // lane_chunk)
    if nb * nl >= 2:
        return bt, lane_chunk
    if B >= 16:
        half = _round_up(-(-B // 2), 8)
        if half < B:
            return half, lane_chunk
    if SD >= 256 and SD % 256 == 0:
        return bt, SD // 2                                # still a multiple of 128
    return bt, lane_chunk


# ----------------------------------------------------------------------------
# Forward wrapper.
# ----------------------------------------------------------------------------
def positional_encoding_forward(
    x: jnp.ndarray,
    pe: jnp.ndarray,
    *,
    use_pallas: bool | None = None,      # None = auto (XLA fallback for tiny inputs)
    donate_input: bool = False,
    tile_budget_bytes: int = 2 << 20,    # ~2 MiB/tile: safe on v5e/v6e/v7x budgets
    xla_fallback_bytes: int = 1 << 20,   # below this a fused XLA add wins
) -> jnp.ndarray:
    """x: [B, S, D]; pe: [max_len, D].  Returns x + pe[:S] broadcast over batch."""
    B, S, D = x.shape
    max_len = pe.shape[0]
    assert S <= max_len, f"sequence length {S} exceeds positional-encoding max_len {max_len}"
    SD = S * D
    itemsize = jnp.dtype(x.dtype).itemsize
    total_bytes = B * SD * itemsize

    # Lane-dense 2-D views; pe cast to x.dtype keeps the add (and stores) in
    # the activation dtype (no silent f32 promotion of the whole tile).
    x2d = x.reshape(B, SD)
    pe2d = pe[:S].reshape(1, SD).astype(x.dtype)

    if use_pallas is None:
        use_pallas = total_bytes > xla_fallback_bytes
    if not use_pallas:
        # Tiny input: fused XLA elementwise add beats any pallas_call launch.
        return (x2d + pe2d).reshape(B, S, D)

    bt, lane_chunk = _choose_tiles(B, SD, itemsize, tile_budget_bytes)
    bt, lane_chunk = _ensure_two_steps(B, SD, bt, lane_chunk)

    grid = (pl.cdiv(B, bt), pl.cdiv(SD, lane_chunk))

    tile_bytes = bt * lane_chunk * itemsize
    pe_tile_bytes = lane_chunk * itemsize
    # double-buffered x tile + double-buffered out tile + double-buffered pe tile + slack
    vmem_needed = 4 * tile_bytes + 2 * pe_tile_bytes + (2 << 20)
    vmem_limit = int(min(max(vmem_needed, 8 << 20), 64 << 20))

    cost = pl.CostEstimate(
        flops=B * SD,
        transcendentals=0,
        bytes_accessed=2 * B * SD * itemsize + SD * itemsize,
    )

    out2d = pl.pallas_call(
        _add_pe_kernel,
        out_shape=jax.ShapeDtypeStruct((B, SD), x.dtype),
        grid=grid,
        in_specs=[
            pl.BlockSpec((bt, lane_chunk), lambda i, j: (i, j)),  # x batch/lane tile
            pl.BlockSpec((1, lane_chunk), lambda i, j: (0, j)),   # pe: follows lane axis only
        ],
        out_specs=pl.BlockSpec((bt, lane_chunk), lambda i, j: (i, j)),
        compiler_params=pltpu.CompilerParams(
            dimension_semantics=("parallel", "parallel"),
            vmem_limit_bytes=vmem_limit,
        ),
        cost_estimate=cost,
        input_output_aliases={0: 0} if donate_input else {},
    )(x2d, pe2d)

    return out2d.reshape(B, S, D)


# ----------------------------------------------------------------------------
# Demo / correctness check.
# ----------------------------------------------------------------------------
if __name__ == "__main__":
    # Module's natural shapes: 4x4 board -> seq = 16, d_model = 32.
    B, S, D = 2, 16, 32
    max_len = 16

    key = jax.random.PRNGKey(0)
    k1, k2 = jax.random.split(key)
    pe = make_positional_encoding(D, max_len)

    # Case 1: demo shape, forced through the Pallas kernel (lane-axis split path).
    x = jax.random.normal(k1, (B, S, D), dtype=jnp.float32)
    out = jax.block_until_ready(positional_encoding_forward(x, pe, use_pallas=True))
    ref = x + pe[None, :S, :]
    np.testing.assert_allclose(np.asarray(out), np.asarray(ref), rtol=1e-6, atol=1e-6)

    # Case 2: larger batch -> batch-axis tiling + >= 2 parallel grid steps.
    x2 = jax.random.normal(k2, (64, S, D), dtype=jnp.float32)
    out2 = jax.block_until_ready(positional_encoding_forward(x2, pe, use_pallas=True))
    ref2 = x2 + pe[None, :S, :]
    np.testing.assert_allclose(np.asarray(out2), np.asarray(ref2), rtol=1e-6, atol=1e-6)

    # Case 3: auto path picks the fused-XLA fallback for the tiny input.
    out3 = jax.block_until_ready(positional_encoding_forward(x, pe))
    np.testing.assert_allclose(np.asarray(out3), np.asarray(ref), rtol=1e-6, atol=1e-6)

    print("KERNEL_OK")
</pallas_src>

<mosaic_0001>
module attributes {stable_mosaic.version = 11 : i64} {
  func.func @_add_pe_kernel(%arg0: i32, %arg1: i32, %arg2: memref<2x256xf32, #tpu.memory_space<vmem>>, %arg3: memref<1x256xf32, #tpu.memory_space<vmem>>, %arg4: memref<2x256xf32, #tpu.memory_space<vmem>>) attributes {dimension_semantics = [#tpu.dimension_semantics<parallel>, #tpu.dimension_semantics<parallel>], iteration_bounds = array<i64: 1, 2>, scalar_prefetch = 0 : i64, scratch_operands = 0 : i64, tpu.core_type = #tpu.core_type<tc>, window_params = [{transform_indices = @transform_0, window_bounds = array<i64: 2, 256>}, {transform_indices = @transform_1, window_bounds = array<i64: 1, 256>}, {transform_indices = @transform_2, window_bounds = array<i64: 2, 256>}]} {
    %c0 = arith.constant 0 : index
    %c0_0 = arith.constant 0 : index
    %0 = vector.load %arg2[%c0, %c0_0] : memref<2x256xf32, #tpu.memory_space<vmem>>, vector<2x256xf32>
    %c0_1 = arith.constant 0 : index
    %c0_2 = arith.constant 0 : index
    %1 = vector.load %arg3[%c0_1, %c0_2] : memref<1x256xf32, #tpu.memory_space<vmem>>, vector<1x256xf32>
    %2 = vector.broadcast %1 : vector<1x256xf32> to vector<2x256xf32>
    %3 = arith.addf %0, %2 : vector<2x256xf32>
    %c0_3 = arith.constant 0 : index
    %c0_4 = arith.constant 0 : index
    %4 = vector.load %arg4[%c0_3, %c0_4] : memref<2x256xf32, #tpu.memory_space<vmem>>, vector<2x256xf32>
    tpu.vector_store %arg4[%c0_3, %c0_4], %3 {strides = array<i32>} : memref<2x256xf32, #tpu.memory_space<vmem>>, vector<2x256xf32>,
    return
  }
  func.func @transform_0(%arg0: i32, %arg1: i32) -> (i32, i32) {
    %c0_i32 = arith.constant 0 : i32
    return %arg0, %arg1 : i32, i32
  }
  func.func @transform_1(%arg0: i32, %arg1: i32) -> (i32, i32) {
    %c0_i32 = arith.constant 0 : i32
    %c0_i32_0 = arith.constant 0 : i32
    return %c0_i32, %arg1 : i32, i32
  }
  func.func @transform_2(%arg0: i32, %arg1: i32) -> (i32, i32) {
    %c0_i32 = arith.constant 0 : i32
    return %arg0, %arg1 : i32, i32
  }
}

</mosaic_0001>

<bundles_post_ra>
// kernel: tpu_custom_call.1
= control target key start
LH: loop header
LB: loop body
LE: loop exit
PB: predicated region body
PF: predicated region fallthrough
CT: control target
= control target key end

     0   :  { %7 = vsyncpa [#allocation3], 0  ;;  %s747_s0 = inlined_call_operand.hbm [shape: f32[2,512], index: 0, kind: input, shape index: {}]   ;;  %s748_s1 = inlined_call_operand.hbm [shape: f32[1,512], index: 1, kind: input, shape index: {}]   ;;  %s749_s2 = inlined_call_operand.hbm [shape: f32[2,512], index: 2, kind: output, shape index: {}]  }
   0x1   :  { %9 = vsyncpa [#allocation3 + $0x1], 0 }
   0x2   :  { %10 = vsyncpa [#allocation6], 0 }
   0x3   :  { %12 = vsyncpa [#allocation6 + $0x1], 0 }
   0x4   :  { %13 = vsyncpa [#allocation4], 0 }
   0x5   :  { %15 = vsyncpa [#allocation4 + $0x1], 0  ;;  %s609_s9 = smov 0   ;;  %s611_s10 = smov 0  }
   0x6   :  { %s613_s11 = smov 0   ;;  %s615_s12 = smov 0  }
   0x7   :  { %s617_s13 = smov 0   ;;  %s619_s14 = smov 0  }
   0x8 LB: > { %s359_s15 = sadd.s32 4294967295, %s592_s14   ;;  %s360_s16 = sadd.s32 4294967294, %s592_s14   ;;  %s592_s14 = sphi %s619_s14, %s21_s14   ;;  %s588_s13 = sphi %s617_s13, %s759_s13   ;;  %s584_s12 = sphi %s615_s12, %s758_s12   ;;  %s580_s11 = sphi %s613_s11, %s757_s11   ;;  %s576_s10 = sphi %s611_s10, %s756_s10   ;;  %s572_s9 = sphi %s609_s9, %s755_s9  }
   0x9   : > { %s30_s17 = sadd.s32 1, %s588_s13  ;;  %s42_s18 = sadd.s32 1, %s580_s11 }
   0xa   : > { %p31_p0 = scmp.ge.s32.totalorder %s30_s17, 2  ;;  %p49_p1 = scmp.ne.s32.totalorder %s580_s11, %s576_s10 }
   0xb   : > { %p50_p2 = scmp.eq.s32.totalorder %s592_s14, 0  ;;  %p55_p3 = scmp.ne.s32.totalorder %s576_s10, %s572_s9 }
   0xc   : > { %s761_s17 = smov (%p31_p0, %s30_s17), 0  ;;  %p56_p5 = scmp.eq.s32.totalorder %s359_s15, 0 }
   0xd   : > { %p650_p4 = por %p50_p2, %p49_p1  ;;  %s38_s20 = ssub.s32 %s588_s13, %s761_s17 }
   0xe   : > { %p107_p6 = scmp.eq.s32.totalorder %s359_s15, 1  ;;  %p40_p7 = scmp.eq.s32.totalorder %s38_s20, 0 }
   0xf   : > { %p656_p8 = por %p56_p5, %p55_p3  ;;  %p113_p10 = scmp.eq.s32.totalorder %s360_s16, 1 }
  0x10   : > { %p660_p9 = por %p107_p6, %p49_p1  ;;  %p362_p12 = scmp.ge.s32.totalorder %s592_s14, 2 }
  0x11   : > { %s665_s23 = scalar_select %p40_p7, %s580_s11, %s42_s18  }
  0x12   : > { %p667_p11 = por %p113_p10, %p55_p3  ;;  %p396_p13 = scmp.lt.s32.totalorder %s592_s14, 2 }
  0x13   : > { %s133_s25 = sand.u32 1, %s580_s11   ;;  %s377_s27 = sshll.u32 %s588_s13, 2 }
  0x14   : > { %s363_s26 = sshll.u32 %s133_s25, 2  ;;  %s144_s30 = scalar_lea.hbm %s747_s0, %s377_s27 }
  0x15   : > { %s137_s3 = scalar_lea.vmem [#allocation2], %s363_s26  ;;  %s146_s5 = sshll.u32 %s144_s30, 4  ;;  %s147_s5 = int_to_ptr.hbm [resolvable:$true] %s146_s5 }
  0x16   : > { %s148_s4 = sshll.u32 %s137_s3, 4  ;;  %p680_p0 = pnand %p396_p13, %p650_p4  ;;  %s149_s4 = int_to_ptr.vmem [resolvable:$true] %s148_s4 }
  0x17   : > { %p368_p1 = scmp.ge.s32.totalorder %s592_s14, 1  ;;  %p172_p2 = scmp.lt.s32.totalorder %s592_s14, 3 }
  0x18   : > { %s134_s7 = scalar_lea.sflag [#allocation3], %s133_s25  ;;  %s366_s8 = sshll.u32 %s133_s25, 1 }
  0x19   : > { %388 = dma.hbm_to_vmem [thread:$0]  (!%p680_p0), %s147_s5, 64, %s149_s4, %s134_s7  }
  0x1a   : > { %p173_p3 = pnand %p368_p1, %p172_p2  ;;  %s367_s15 = sshll.u32 %s588_s13, 1 }
  0x1b   : > { %s163_s20 = scalar_lea.hbm %s748_s1, %s367_s15  ;;  %s159_s26 = scalar_lea.vmem [#allocation5], %s366_s8 }
  0x1c   : > { %s167_s19 = sshll.u32 %s159_s26, 4  ;;  %s165_s27 = sshll.u32 %s163_s20, 4  ;;  %s168_s19 = int_to_ptr.vmem [resolvable:$true] %s167_s19  ;;  %s166_s27 = int_to_ptr.hbm [resolvable:$true] %s165_s27 }
  0x1d   : > { %s156_s28 = scalar_lea.sflag [#allocation6], %s133_s25  ;;  %176 = sbr.rel (%p173_p3) target bundleno = 53 (0x35), region = 28 }
  0x1e   : > { %391 = dma.hbm_to_vmem [thread:$0]  (!%p680_p0), %s166_s27, 32, %s168_s19, %s156_s28  }
  0x1f   : > { %s695_s29 = sand.u32 (!%p173_p3), 1, %s576_s10  }
  0x20   : > { %s369_s30 = sshll.u32 (!%p173_p3), %s695_s29, 2  ;;  %s179_s3 = scalar_lea.sflag (!%p173_p3), [#allocation3], %s695_s29 }
  0x21   : > { %s182_s4 = scalar_lea.vmem (!%p173_p3), [#allocation2], %s369_s30 }
  0x22   : > { %559 = dma.done.wait (%p656_p8), %s179_s3, 64  }
  0x23   : > { %561 = vsyncadd (%p656_p8), %s179_s3, 4294967232  ;;  %s370_s25 = sshll.u32 %s695_s29, 1  ;;  %s189_s5 = scalar_lea.sflag [#allocation6], %s695_s29 }
  0x24   : > { %s192_s6 = scalar_lea.vmem [#allocation5], %s370_s25 }
  0x25   : > { %563 = dma.done.wait (%p656_p8), %s189_s5, 32  }
  0x26   : > { %565 = vsyncadd (%p656_p8), %s189_s5, 4294967264  ;;  %s378_s7 = sshll.u32 %s584_s12, 2  ;;  %v223_v0 = vld [vmem:[%s192_s6] sm:$0x3]  ;;  %vm228_vm0 = vcmask 1041408   ;;  %s218_s18 = scalar_lea.vmem [#allocation7], %s369_s30 }
  0x27   : > { %s247_s16 = scalar_lea.hbm %s749_s2, %s378_s7  ;;  %v225_v1 = vperm.slane %v223_v0, 0  ;;  %v226_v2 = vperm.slane %v223_v0, 1  ;;  %v222_v3 = vld [vmem:[%s182_s4] sm:$0xf]  ;;  %s249_s20 = sshll.u32 %s218_s18, 4  ;;  %s250_s20 = int_to_ptr.vmem [resolvable:$true] %s249_s20 }
  0x28   : > { %s251_s26 = sshll.u32 %s247_s16, 4  ;;  %s234_s12 = scalar_lea.sflag [#allocation4], %s695_s29  ;;  %s252_s26 = int_to_ptr.hbm [resolvable:$true] %s251_s26 }
  0x29   : > { %v227_v4 = vrot.slane %v226_v2, 6  ;;  %s520_s21 = sshra.s32 %s252_s26, 4  ;;  %s526_s3 = scalar_lea.hbm %s749_s2, 8  ;;  %s521_s21 = int_to_ptr.hbm [resolvable:$true] %s520_s21 }
  0x2a   : > { %s522_s19 = scalar_lea.hbm %s521_s21, 4  ;;  %p527_p7 = scmp.lt.s32.totalorder %s521_s21, %s749_s2 }
  0x2b   : > { %v229_v5 = vsel %vm228_vm0, %v225_v1, %v227_v4  ;;  %p523_p4 = scmp.ne.s32.totalorder %s521_s21, %s522_s19  ;;  %p528_p8 = scmp.lt.s32.totalorder %s526_s3, %s522_s19 }
  0x2c   : > { %v231_v6 = vadd.f32 %v229_v5, %v222_v3 }
  0x2d   : > { %p524_p5 = pnand %p523_p4, %p660_p9  ;;  %p529_p10 = por %p528_p8, %p527_p7 }
  0x2e   : > { %232 = vst [vmem:[%s218_s18] sm:$0xf] %v231_v6 }
  0x2f   : > { %p525_p6 = pneg %p524_p5 }
  0x31   : > { %p530_p13 = pnand %p529_p10, %p525_p6 }
  0x33   : > { %533 = shalt.err (!%p530_p13)
}
  0x34   : > { %383 = dma.vmem_to_hbm [thread:$0]  (%p660_p9), %s250_s20, 64, %s252_s26, %s234_s12  }
  0x35 PF: > { %s263_s29 = sand.u32 1, %s572_s9   ;;  %p393_p0 = pnand %p362_p12, %p667_p11 }
  0x36   : > { %s264_s25 = scalar_lea.sflag [#allocation4], %s263_s29 }
  0x37   : > { %p394_p1 = pneg %p393_p0 }
  0x39   : > { %567 = dma.done.wait (%p394_p1), %s264_s25, 64  }
  0x3a   : > { %569 = vsyncadd (%p394_p1), %s264_s25, 4294967232  ;;  %s21_s14 = sadd.s32 1, %s592_s14   ;;  %s755_s9 = smov %s576_s10 }
  0x3b   : > { %p18_p2 = scmp.ge.s32.totalorder %s21_s14, 4   ;;  %s756_s10 = smov %s580_s11 }
  0x3c   : > { %s757_s11 = smov %s665_s23  ;;  %s758_s12 = smov %s588_s13 }
  0x3d   : > { %s759_s13 = smov %s761_s17  ;;  %20 = sbr.rel (!%p18_p2) target bundleno = 8 (0x8), region = 86 }
  0x42   :  { %270 = vsyncpa [#allocation3], 1 }
  0x43   :  { %272 = vsyncpa [#allocation3 + $0x1], 1 }
  0x44   :  { %273 = vsyncpa [#allocation6], 1 }
  0x45   :  { %275 = vsyncpa [#allocation6 + $0x1], 1 }
  0x46   :  { %276 = vsyncpa [#allocation4], 1 }
  0x47   :  { %278 = vsyncpa [#allocation4 + $0x1], 1 }

</bundles_post_ra>
